<compile_context>
chip_gen: v7x
topology: tpu7x:2x2x1
jax: 0.10.0
libtpu: 0.0.40
codegen_flags: <defaults>
</compile_context>

<pallas_src>
import jax
import jax.numpy as jnp
from jax import lax
from jax.experimental import pallas as pl
from jax.experimental.pallas import tpu as pltpu


def _round_up(n, m):
    return ((n + m - 1) // m) * m


def lowrank_kernel(x_ref, u_ref, v_ref, o_ref):
    # x_ref: (tm, in_features)      compute dtype
    # u_ref: (rank_p, in_features)  compute dtype (PyTorch U.weight layout, rank-padded)
    # v_ref: (tn, rank_p)           compute dtype (PyTorch V.weight layout, padded)
    # o_ref: (tm, tn)
    # tmp = x @ U^T  -> contract x axis 1 with U axis 1 (no transposed copy materialized)
    tmp = lax.dot_general(
        x_ref[...], u_ref[...],
        dimension_numbers=(((1,), (1,)), ((), ())),
        preferred_element_type=jnp.float32,
    )
    # Single cast back to the compute dtype for the second MXU matmul
    # (keeps f32 elementwise work off the VPU, esp. on v5e).
    tmp = tmp.astype(x_ref.dtype)
    # out = tmp @ V^T -> contract tmp axis 1 (rank) with V axis 1 (rank)
    out = lax.dot_general(
        tmp, v_ref[...],
        dimension_numbers=(((1,), (1,)), ((), ())),
        preferred_element_type=jnp.float32,
    )
    o_ref[...] = out.astype(o_ref.dtype)


def low_rank_linear(x, u_weight, v_weight, *, tm=512, tn=None,
                    compute_dtype=jnp.bfloat16, out_dtype=None):
    """Pallas TPU forward for LowRankLinear.

    x:        (M, in_features)
    u_weight: (rank, in_features)   -- nn.Linear(in_features, rank).weight
    v_weight: (out_features, rank)  -- nn.Linear(rank, out_features).weight
    Returns (M, out_features) = x @ U^T @ V^T   (both Linears are bias-free).

    tm:  row tile (clamped to problem size, 8-aligned). Sweep 256-1024.
    tn:  optional out_features tile (multiple of 128) -- use on v7x to bound
         per-step VMEM; None keeps V fully resident (best on v5e/v6e).
    compute_dtype: matmul input dtype (bf16 default; f32 accumulation always).
    """
    M, in_features = x.shape
    rank, in_f2 = u_weight.shape
    out_features, rank2 = v_weight.shape
    assert in_f2 == in_features and rank2 == rank

    out_dtype = x.dtype if out_dtype is None else out_dtype
    compute_dtype = x.dtype if compute_dtype is None else compute_dtype

    # ---- lane-dense padding of the small dims (weights only; x untouched) ----
    rank_p = _round_up(rank, 128)
    out_p = _round_up(out_features, 128)
    u_p = jnp.pad(u_weight, ((0, rank_p - rank), (0, 0))).astype(compute_dtype)
    v_p = jnp.pad(v_weight, ((0, out_p - out_features), (0, rank_p - rank))
                  ).astype(compute_dtype)

    # ---- row tiling: big tiles, tail handled by padding (no divisibility assert) ----
    tm_eff = _round_up(min(tm, M), 8)
    m_pad = _round_up(M, tm_eff)
    x_c = x.astype(compute_dtype)
    if m_pad != M:
        x_c = jnp.pad(x_c, ((0, m_pad - M), (0, 0)))

    # ---- optional out_features tiling (v7x VMEM budget) ----
    if tn is None:
        tn_eff = out_p
    else:
        tn_eff = min(_round_up(tn, 128), out_p)
        if out_p % tn_eff != 0:
            tn_eff = out_p  # fall back to fully-resident V if tn doesn't divide

    grid = (m_pad // tm_eff, out_p // tn_eff)

    # ---- explicit VMEM budget from the tile sizes (double-buffered specs) ----
    cbytes = jnp.dtype(compute_dtype).itemsize
    obytes = jnp.dtype(out_dtype).itemsize
    vmem_est = (2 * cbytes * (tm_eff * in_features     # x tile
                              + rank_p * in_features   # U (resident)
                              + tn_eff * rank_p)       # V tile
                + 2 * obytes * tm_eff * tn_eff         # out tile
                + 4 * tm_eff * rank_p)                 # f32 intermediate
    vmem_limit = max(32 * 1024 * 1024,
                     min(2 * int(vmem_est), 64 * 1024 * 1024))

    xbytes = jnp.dtype(x.dtype).itemsize
    cost = pl.CostEstimate(
        flops=2 * M * in_features * rank + 2 * M * rank * out_features,
        transcendentals=0,
        bytes_accessed=(M * in_features * xbytes
                        + rank * in_features * cbytes
                        + out_features * rank * cbytes
                        + M * out_features * obytes),
    )

    out_padded = pl.pallas_call(
        lowrank_kernel,
        out_shape=jax.ShapeDtypeStruct((m_pad, out_p), out_dtype),
        grid_spec=pltpu.PrefetchScalarGridSpec(
            num_scalar_prefetch=0,
            grid=grid,
            in_specs=[
                pl.BlockSpec((tm_eff, in_features), lambda i, j: (i, 0)),
                pl.BlockSpec((rank_p, in_features), lambda i, j: (0, 0)),
                pl.BlockSpec((tn_eff, rank_p), lambda i, j: (j, 0)),
            ],
            out_specs=pl.BlockSpec((tm_eff, tn_eff), lambda i, j: (i, j)),
        ),
        compiler_params=pltpu.CompilerParams(
            dimension_semantics=("parallel", "parallel"),
            vmem_limit_bytes=vmem_limit,
        ),
        cost_estimate=cost,
    )(x_c, u_p, v_p)

    # Slice off row / lane padding.
    return out_padded[:M, :out_features]


if __name__ == "__main__":
    # Small shapes consistent with the module's __init__ (nn.Linear weights,
    # bias=False on both projections).
    in_features, out_features, rank = 32, 64, 8
    M = 16  # batch-like rows flattened

    key = jax.random.PRNGKey(0)
    kx, ku, kv = jax.random.split(key, 3)

    # Deterministic init mirroring nn.Linear's uniform(-1/sqrt(fan_in), 1/sqrt(fan_in)).
    u_bound = 1.0 / jnp.sqrt(jnp.float32(in_features))
    v_bound = 1.0 / jnp.sqrt(jnp.float32(rank))
    U_weight = jax.random.uniform(ku, (rank, in_features), jnp.float32,
                                  minval=-u_bound, maxval=u_bound)
    V_weight = jax.random.uniform(kv, (out_features, rank), jnp.float32,
                                  minval=-v_bound, maxval=v_bound)
    x = jax.random.normal(kx, (M, in_features), jnp.float32)

    # Reference forward: V(U(x)) = x @ U^T @ V^T (no biases).
    y_ref = (x @ U_weight.T) @ V_weight.T

    # Exact-precision path (f32 compute) -- tight check.
    y_f32 = low_rank_linear(x, U_weight, V_weight, compute_dtype=jnp.float32)
    y_f32 = jax.block_until_ready(y_f32)
    assert y_f32.shape == (M, out_features)
    assert jnp.allclose(y_f32, y_ref, atol=1e-5, rtol=1e-5)

    # Default perf path (bf16 MXU inputs, f32 accumulation) -- looser check.
    y_bf16 = low_rank_linear(x, U_weight, V_weight)
    y_bf16 = jax.block_until_ready(y_bf16)
    assert y_bf16.shape == (M, out_features)
    assert jnp.allclose(y_bf16.astype(jnp.float32), y_ref, atol=5e-2, rtol=5e-2)

    print("KERNEL_OK")
</pallas_src>

<mosaic_0001>
module attributes {stable_mosaic.version = 11 : i64} {
  func.func @lowrank_kernel(%arg0: i32, %arg1: i32, %arg2: memref<16x32xf32, #tpu.memory_space<vmem>>, %arg3: memref<128x32xf32, #tpu.memory_space<vmem>>, %arg4: memref<128x128xf32, #tpu.memory_space<vmem>>, %arg5: memref<16x128xf32, #tpu.memory_space<vmem>>) attributes {dimension_semantics = [#tpu.dimension_semantics<parallel>, #tpu.dimension_semantics<parallel>], iteration_bounds = array<i64: 1, 1>, scalar_prefetch = 0 : i64, scratch_operands = 0 : i64, tpu.core_type = #tpu.core_type<tc>, window_params = [{transform_indices = @transform_0, window_bounds = array<i64: 16, 32>}, {pipeline_mode = #tpu.pipeline_mode<synchronous>, transform_indices = @transform_1, window_bounds = array<i64: 128, 32>}, {transform_indices = @transform_2, window_bounds = array<i64: 128, 128>}, {transform_indices = @transform_3, window_bounds = array<i64: 16, 128>}]} {
    %c0 = arith.constant 0 : index
    %c0_0 = arith.constant 0 : index
    %0 = vector.load %arg2[%c0, %c0_0] : memref<16x32xf32, #tpu.memory_space<vmem>>, vector<16x32xf32>
    %c0_1 = arith.constant 0 : index
    %c0_2 = arith.constant 0 : index
    %1 = vector.load %arg3[%c0_1, %c0_2] : memref<128x32xf32, #tpu.memory_space<vmem>>, vector<128x32xf32>
    %cst = arith.constant dense<0.000000e+00> : vector<16x128xf32>
    %2 = tpu.matmul %0, %1, %cst {dimension_numbers = #tpu.dot_dimension_numbers<[1], [1], [0], [0], [0, 0, 1, 0], [], []>} : vector<16x32xf32>, vector<128x32xf32>, vector<16x128xf32> -> vector<16x128xf32>
    %c0_3 = arith.constant 0 : index
    %c0_4 = arith.constant 0 : index
    %3 = vector.load %arg4[%c0_3, %c0_4] : memref<128x128xf32, #tpu.memory_space<vmem>>, vector<128x128xf32>
    %cst_5 = arith.constant dense<0.000000e+00> : vector<16x128xf32>
    %4 = tpu.matmul %2, %3, %cst_5 {dimension_numbers = #tpu.dot_dimension_numbers<[1], [1], [0], [0], [0, 0, 1, 0], [], []>} : vector<16x128xf32>, vector<128x128xf32>, vector<16x128xf32> -> vector<16x128xf32>
    %c0_6 = arith.constant 0 : index
    %c0_7 = arith.constant 0 : index
    %5 = vector.load %arg5[%c0_6, %c0_7] : memref<16x128xf32, #tpu.memory_space<vmem>>, vector<16x128xf32>
    tpu.vector_store %arg5[%c0_6, %c0_7], %4 {strides = array<i32>} : memref<16x128xf32, #tpu.memory_space<vmem>>, vector<16x128xf32>,
    return
  }
  func.func @transform_0(%arg0: i32, %arg1: i32) -> (i32, i32) {
    %c0_i32 = arith.constant 0 : i32
    %c0_i32_0 = arith.constant 0 : i32
    return %arg0, %c0_i32 : i32, i32
  }
  func.func @transform_1(%arg0: i32, %arg1: i32) -> (i32, i32) {
    %c0_i32 = arith.constant 0 : i32
    %c0_i32_0 = arith.constant 0 : i32
    %c0_i32_1 = arith.constant 0 : i32
    return %c0_i32, %c0_i32_0 : i32, i32
  }
  func.func @transform_2(%arg0: i32, %arg1: i32) -> (i32, i32) {
    %c0_i32 = arith.constant 0 : i32
    %c0_i32_0 = arith.constant 0 : i32
    return %arg1, %c0_i32 : i32, i32
  }
  func.func @transform_3(%arg0: i32, %arg1: i32) -> (i32, i32) {
    %c0_i32 = arith.constant 0 : i32
    return %arg0, %arg1 : i32, i32
  }
}

</mosaic_0001>

<bundles_post_ra>
// kernel: tpu_custom_call.1
= control target key start
LH: loop header
LB: loop body
LE: loop exit
PB: predicated region body
PF: predicated region fallthrough
CT: control target
= control target key end

     0   :  { %vm33_vm0 = vcmask 261120   ;;  %s680_s0 = inlined_call_operand.vmem [shape: f32[16,32], index: 0, kind: input, shape index: {}]   ;;  %s681_s1 = inlined_call_operand.vmem [shape: f32[128,32], index: 1, kind: input, shape index: {}]   ;;  %s682_s2 = inlined_call_operand.vmem [shape: f32[128,128], index: 2, kind: input, shape index: {}]   ;;  %s683_s3 = inlined_call_operand.hbm [shape: f32[16,128], index: 3, kind: output, shape index: {}]  }
   0x1   :  { %v17_v0 = vld [vmem:[%s681_s1] sm:$0xff]  ;;  %v18_v1 = vld [vmem:[%s681_s1 + $0x8] sm:$0xff]  ;;  %v19_v2 = vld [vmem:[%s681_s1 + $0x10] sm:$0xff] }
   0x2   :  { %v396_v3 = vpack.c.bf16 %v18_v1, %v17_v0  ;;  %vm537_vm1 = vmpackc.low %vm33_vm0, %vm33_vm0  ;;  %v20_v5 = vld [vmem:[%s681_s1 + $0x18] sm:$0xff]  ;;  %v21_v7 = vld [vmem:[%s681_s1 + $0x20] sm:$0xff] }
   0x3   :  { %v402_v6 = vpack.c.bf16 %v20_v5, %v19_v2  ;;  %v15_v8 = vld [vmem:[%s680_s0] sm:$0xff]  ;;  %v22_v9 = vld [vmem:[%s681_s1 + $0x28] sm:$0xff]  ;;  %v165_v13 = vld [vmem:[%s682_s2 + $0x10] sm:$0xff] }
   0x4   :  { %398 = vmatprep.subr.msk.bf16.mxu0 %vm537_vm1, %v396_v3  ;;  %358 = vmatprep.mubr.msk.f32.mxu0 %vm33_vm0, %v15_v8  ;;  %v163_v10 = vld [vmem:[%s682_s2] sm:$0xff]  ;;  %v164_v11 = vld [vmem:[%s682_s2 + $0x8] sm:$0xff]  ;;  %v166_v14 = vld [vmem:[%s682_s2 + $0x18] sm:$0xff]  ;;  %v408_v16 = vpack.c.bf16 %v22_v9, %v21_v7 }
   0x5   :  { %401 = vmatpush3.bf16.xpose.msk.msra.mxu0 %vm537_vm1, %v396_v3  ;;  %v444_v12 = vpack.c.bf16 %v164_v11, %v163_v10  ;;  %v448_v15 = vpack.c.bf16 %v166_v14, %v165_v13 }
   0x6   :  { %404 = vmatprep.subr.msk.bf16.mxu0 %vm537_vm1, %v402_v6 }
   0x7   :  { %445 = vmatprep.subr.bf16.mxu1 %v444_v12 }
   0x8   :  { %447 = vmatpush3.bf16.xpose.msra.mxu1 %v444_v12 }
   0x9   :  { %449 = vmatprep.subr.bf16.mxu1 %v448_v15 }
   0xa   :  { %8 = vsyncpa [#allocation3], 0  ;;  %v167_v17 = vld [vmem:[%s682_s2 + $0x20] sm:$0xff]  ;;  %v168_v18 = vld [vmem:[%s682_s2 + $0x28] sm:$0xff] }
   0xb   :  { %v23_v19 = vld [vmem:[%s681_s1 + $0x30] sm:$0xff]  ;;  %v24_v20 = vld [vmem:[%s681_s1 + $0x38] sm:$0xff]  ;;  %v452_v21 = vpack.c.bf16 %v168_v18, %v167_v17  ;;  %v25_v25 = vld [vmem:[%s681_s1 + $0x40] sm:$0xff] }
   0xc   :  { %v414_v22 = vpack.c.bf16 %v24_v20, %v23_v19  ;;  %v169_v23 = vld [vmem:[%s682_s2 + $0x30] sm:$0xff]  ;;  %v170_v24 = vld [vmem:[%s682_s2 + $0x38] sm:$0xff]  ;;  %v26_v26 = vld [vmem:[%s681_s1 + $0x48] sm:$0xff] }
   0xd   :  { %407 = vmatpush3.bf16.xpose.msk.msra.mxu0 %vm537_vm1, %v402_v6  ;;  %v456_v27 = vpack.c.bf16 %v170_v24, %v169_v23  ;;  %v420_v28 = vpack.c.bf16 %v26_v26, %v25_v25  ;;  %v171_v29 = vld [vmem:[%s682_s2 + $0x40] sm:$0xff]  ;;  %v172_v30 = vld [vmem:[%s682_s2 + $0x48] sm:$0xff]  ;;  %v27_v31 = vld [vmem:[%s681_s1 + $0x50] sm:$0xff] }
   0xe   :  { %410 = vmatprep.subr.msk.bf16.mxu0 %vm537_vm1, %v408_v16  ;;  %v28_v32 = vld [vmem:[%s681_s1 + $0x58] sm:$0xff]  ;;  %v460_v33 = vpack.c.bf16 %v172_v30, %v171_v29  ;;  %v173_v35 = vld [vmem:[%s682_s2 + $0x50] sm:$0xff]  ;;  %v29_v37 = vld [vmem:[%s681_s1 + $0x60] sm:$0xff] }
   0xf   :  { %v426_v34 = vpack.c.bf16 %v28_v32, %v27_v31  ;;  %v174_v36 = vld [vmem:[%s682_s2 + $0x58] sm:$0xff]  ;;  %v30_v38 = vld [vmem:[%s681_s1 + $0x68] sm:$0xff]  ;;  %v175_v41 = vld [vmem:[%s682_s2 + $0x60] sm:$0xff] }
  0x10   :  { %451 = vmatpush3.bf16.xpose.msra.mxu1 %v448_v15  ;;  %v464_v39 = vpack.c.bf16 %v174_v36, %v173_v35  ;;  %v432_v40 = vpack.c.bf16 %v30_v38, %v29_v37  ;;  %v176_v42 = vld [vmem:[%s682_s2 + $0x68] sm:$0xff]  ;;  %v31_v43 = vld [vmem:[%s681_s1 + $0x70] sm:$0xff]  ;;  %v32_v44 = vld [vmem:[%s681_s1 + $0x78] sm:$0xff] }
  0x11   :  { %453 = vmatprep.subr.bf16.mxu1 %v452_v21  ;;  %v468_v45 = vpack.c.bf16 %v176_v42, %v175_v41  ;;  %v438_v46 = vpack.c.bf16 %v32_v44, %v31_v43  ;;  %v177_v47 = vld [vmem:[%s682_s2 + $0x70] sm:$0xff]  ;;  %v178_v48 = vld [vmem:[%s682_s2 + $0x78] sm:$0xff]  ;;  %v16_v50 = vld [vmem:[%s680_s0 + $0x8] sm:$0xff]  ;;  %s503_s2 = smov [#allocation2]  }
  0x12   :  { %v472_v49 = vpack.c.bf16 %v178_v48, %v177_v47  ;;  %s261_s25 = sshll.u32 %s503_s2, 4  ;;  %s262_s25 = int_to_ptr.vmem [resolvable:$true] %s261_s25 }
  0x13   :  { %s479_s26 = scalar_lea.vmem %s262_s25, 256  ;;  %p484_p1 = scmp.lt.s32.totalorder %s262_s25, %s262_s25 }
  0x14   :  { %p480_p0 = scmp.ne.s32.totalorder %s262_s25, %s479_s26  ;;  %p485_p2 = scmp.lt.s32.totalorder %s479_s26, %s479_s26 }
  0x15   :  { %413 = vmatpush3.bf16.xpose.msk.msra.mxu0 %vm537_vm1, %v408_v16 }
  0x16   :  { %416 = vmatprep.subr.msk.bf16.mxu0 %vm537_vm1, %v414_v22  ;;  %p486_p3 = por %p485_p2, %p484_p1 }
  0x18   :  { %455 = vmatpush3.bf16.xpose.msra.mxu1 %v452_v21  ;;  %p487_p4 = pnand %p486_p3, %p480_p0 }
  0x19   :  { %457 = vmatprep.subr.bf16.mxu1 %v456_v27 }
  0x1d   :  { %419 = vmatpush3.bf16.xpose.msk.msra.mxu0 %vm537_vm1, %v414_v22 }
  0x1e   :  { %422 = vmatprep.subr.msk.bf16.mxu0 %vm537_vm1, %v420_v28 }
  0x20   :  { %459 = vmatpush3.bf16.xpose.msra.mxu1 %v456_v27 }
  0x21   :  { %461 = vmatprep.subr.bf16.mxu1 %v460_v33 }
  0x25   :  { %425 = vmatpush3.bf16.xpose.msk.msra.mxu0 %vm537_vm1, %v420_v28 }
  0x26   :  { %428 = vmatprep.subr.msk.bf16.mxu0 %vm537_vm1, %v426_v34 }
  0x28   :  { %463 = vmatpush3.bf16.xpose.msra.mxu1 %v460_v33 }
  0x29   :  { %465 = vmatprep.subr.bf16.mxu1 %v464_v39 }
  0x2d   :  { %431 = vmatpush3.bf16.xpose.msk.msra.mxu0 %vm537_vm1, %v426_v34 }
  0x2e   :  { %434 = vmatprep.subr.msk.bf16.mxu0 %vm537_vm1, %v432_v40 }
  0x30   :  { %467 = vmatpush3.bf16.xpose.msra.mxu1 %v464_v39 }
  0x31   :  { %469 = vmatprep.subr.bf16.mxu1 %v468_v45 }
  0x35   :  { %437 = vmatpush3.bf16.xpose.msk.msra.mxu0 %vm537_vm1, %v432_v40 }
  0x36   :  { %440 = vmatprep.subr.msk.bf16.mxu0 %vm537_vm1, %v438_v46 }
  0x38   :  { %471 = vmatpush3.bf16.xpose.msra.mxu1 %v468_v45 }
  0x39   :  { %473 = vmatprep.subr.bf16.mxu1 %v472_v49 }
  0x3d   :  { %443 = vmatpush3.bf16.xpose.msk.msra.mxu0 %vm537_vm1, %v438_v46 }
  0x40   :  { %475 = vmatpush3.bf16.xpose.msra.mxu1 %v472_v49 }
  0x44   :  { %359 = vmatmul.mubr.msk.f32.vlgmr.msra.gmra.mrb[0].mxu0 %vm33_vm0, %v16_v50 }
 0x117   :  { %v360_v51 = vpop.f32.mrb[0].mxu0 }
 0x118   :  { %v154_v52 = vpop.f32.mrb[1].mxu0 }
 0x119   :  { %393 = vmatprep.mubr.f32.mxu1 %v154_v52 }
 0x11a   :  { %394 = vmatmul.mubr.f32.vlgmr.msra.gmra.mrb[0].mxu1 %v360_v51 }
 0x1ed   :  { %v395_v53 = vpop.f32.mrb[0].mxu1 }
 0x1ee   :  { %255 = vst [vmem:[#allocation2 + $0x8] sm:$0xff] %v395_v53  ;;  %v245_v54 = vpop.f32.mrb[1].mxu1 }
 0x1ef   :  { %254 = vst [vmem:[#allocation2] sm:$0xff] %v245_v54 }
 0x1f0   :  { %490 = shalt.err (!%p487_p4)
}
 0x1f1   :  { %s491_s28 = scalar_lea.hbm %s683_s3, 256 }
 0x1f2   :  { %p492_p5 = scmp.ne.s32.totalorder %s683_s3, %s491_s28  ;;  %p495_p6 = scmp.lt.u32.totalorder %s491_s28, %s683_s3 }
 0x1f4   :  { %p497_p7 = pnand %p495_p6, %p492_p5 }
 0x1f6   :  { %500 = shalt.err (!%p497_p7)
}
 0x1f7   :  { %s504_s6 = smov 128   ;;  %s505_s7 = smov 8  }
 0x1f8   :  { %267 = dma.vmem_to_hbm [thread:$0]  %s262_s25, 256, %s683_s3, [#allocation3], %s504_s6, %s504_s6, %s505_s7  }
 0x1f9   :  { %501 = dma.done.wait [#allocation3], 256  }
 0x1fa   :  { %502 = vsyncadd [#allocation3], 4294967040 }
 0x1fb   :  { %271 = vsyncpa [#allocation3], 1 }

</bundles_post_ra>
